<compile_context>
chip_gen: v7x
topology: tpu7x:2x2x1
jax: 0.10.0
libtpu: 0.0.40
codegen_flags: <defaults>
</compile_context>

<pallas_src>
import functools

import jax
import jax.numpy as jnp
from jax.experimental import pallas as pl
from jax.experimental.pallas import tpu as pltpu


def _linear_bias_kernel(x_ref, w_ref, b_ref, o_ref, *, compute_dtype):
    # x arrives in its HBM dtype (f32) and is cast right before the MXU issue;
    # the cast is free filler here (kernel is HBM/DMA bound).
    x = x_ref[...].astype(compute_dtype)
    acc = jnp.dot(x, w_ref[...], preferred_element_type=jnp.float32)
    o_ref[...] = (acc + b_ref[...]).astype(o_ref.dtype)


def _round_up(v, align):
    return -(-v // align) * align


def _fit_tile(tile, dim, align):
    """Clamp a tile to `dim`, keeping (8,128) block-shape legality."""
    tile = int(min(tile, dim))
    if tile < dim:
        tile = max(align, (tile // align) * align)
    return tile


def _ensure_two_blocks(tm, tn, M, N):
    """v7x megacore: make sure >= 2 grid blocks exist whenever the problem
    allows, so both TensorCores get work after the tile clamp."""
    if pl.cdiv(M, tm) * pl.cdiv(N, tn) >= 2:
        return tm, tn
    if M > 8:
        half = _round_up(_round_up(M, 2) // 2, 8)
        if half < M:
            return half, tn
    if N > 128:
        half = _round_up(_round_up(N, 2) // 2, 128)
        if half < N:
            return tm, half
    return tm, tn


def linear_pallas(x2d, w_t, bias2d, *, tm=1024, tn=2048,
                  compute_dtype=jnp.bfloat16, out_dtype=jnp.bfloat16):
    """y = x2d @ w_t + bias2d, tiled for TPU.

    x2d:    (M, K) float32 (cast to compute_dtype inside the kernel)
    w_t:    (K, N) compute_dtype (pre-transposed / pre-cast once at init)
    bias2d: (1, N) float32
    returns (M, N) out_dtype
    """
    M, K = x2d.shape
    K2, N = w_t.shape
    assert K == K2 and bias2d.shape == (1, N)

    tm = _fit_tile(tm, M, 8)
    tn = _fit_tile(tn, N, 128)
    tm, tn = _ensure_two_blocks(tm, tn, M, N)
    num_m = pl.cdiv(M, tm)
    num_n = pl.cdiv(N, tn)

    # Grid = (N-blocks, M-blocks), M innermost: the (K, tn) weight block index
    # depends only on the outer axis, so W is DMA'd from HBM exactly once;
    # only the small (tm, K) x tile is re-read num_n times.
    grid = (num_n, num_m)

    x_item = x2d.dtype.itemsize
    w_item = w_t.dtype.itemsize
    b_item = bias2d.dtype.itemsize
    o_item = jnp.dtype(out_dtype).itemsize
    bytes_accessed = (num_n * M * K * x_item    # x re-read once per N pass
                      + K * N * w_item          # W streamed exactly once
                      + num_n * N * b_item      # bias (negligible)
                      + M * N * o_item)         # output written once
    cost = pl.CostEstimate(flops=2 * M * K * N, transcendentals=0,
                           bytes_accessed=bytes_accessed)

    kernel = functools.partial(_linear_bias_kernel, compute_dtype=compute_dtype)
    return pl.pallas_call(
        kernel,
        out_shape=jax.ShapeDtypeStruct((M, N), out_dtype),
        grid=grid,
        in_specs=[
            pl.BlockSpec((tm, K), lambda j, i: (i, 0)),
            pl.BlockSpec((K, tn), lambda j, i: (0, j)),
            pl.BlockSpec((1, tn), lambda j, i: (0, j)),
        ],
        out_specs=pl.BlockSpec((tm, tn), lambda j, i: (i, j)),
        compiler_params=pltpu.CompilerParams(
            dimension_semantics=("parallel", "parallel"),
            vmem_limit_bytes=32 * 1024 * 1024),
        cost_estimate=cost,
    )(x2d, w_t, bias2d)


class DePatchPallas:
    """JAX/Pallas port of DePatch.

    projection = Linear(embed_dim, patch_size**2 * channel)
      weight: (patch_size**2 * channel, embed_dim)   (PyTorch layout)
      bias:   (patch_size**2 * channel,)
    """

    def __init__(self, channel=32, embed_dim=128, patch_size=16, key=None,
                 compute_dtype=jnp.bfloat16, tm=1024, tn=2048):
        self.channel = channel
        self.embed_dim = embed_dim
        self.patch_size = patch_size
        self.compute_dtype = compute_dtype
        self.tm = tm
        self.tn = tn

        out_dim = patch_size ** 2 * channel
        if key is None:
            key = jax.random.PRNGKey(0)
        kw, kb = jax.random.split(key)
        bound = 1.0 / (embed_dim ** 0.5)
        self.weight = jax.random.uniform(
            kw, (out_dim, embed_dim), jnp.float32, -bound, bound)
        self.bias = jax.random.uniform(
            kb, (out_dim,), jnp.float32, -bound, bound)

        # Pre-transposed / pre-cast kernel parameters (done once, not per call).
        self.weight_t = jnp.asarray(self.weight.T, dtype=compute_dtype)  # (K, N)
        self.bias2d = self.bias.reshape(1, -1)                           # f32 (1, N)
        # Intermediate (pre-rearrange) dtype follows compute_dtype: bf16 halves
        # the kernel's output write and the rearrange's read.
        self.out_dtype = compute_dtype

    def __call__(self, x, ori):
        """x: (b, num_tokens, embed_dim) f32; ori: (b, c, h, w) shape tuple.

        Returns NCHW tensor (b, channel, h, w) in float32."""
        b_o, c_o, h, w = ori
        p = self.patch_size
        h_ = h // p
        w_ = w // p
        b, n_tok, e = x.shape
        assert e == self.embed_dim
        assert n_tok == h_ * w_

        # --- hot path in Pallas: tiled linear projection (in-kernel bf16 cast,
        #     f32 accumulate, bf16 intermediate store) ---
        x2d = x.reshape(b * n_tok, e)   # stays f32; cast happens in-kernel
        y2d = linear_pallas(x2d, self.weight_t, self.bias2d,
                            tm=self.tm, tn=self.tn,
                            compute_dtype=self.compute_dtype,
                            out_dtype=self.out_dtype)

        # --- rearrange glue (single XLA transpose in the intermediate dtype),
        #     matching einops: 'b (h w) (p1 p2 c) -> b c (h p1) (w p2)'
        # TODO(synk): fuse this rearrange into the kernel's output path; the
        # blocker is the in-kernel (w_, p1, p2, c) -> (c, p1, w_, p2) shuffle.
        c = self.channel
        y = y2d.reshape(b, h_, w_, p, p, c)       # b, h, w, p1, p2, c
        y = jnp.transpose(y, (0, 5, 1, 3, 2, 4))  # b, c, h, p1, w, p2
        y = y.reshape(b, c, h_ * p, w_ * p)       # b, c, (h p1), (w p2)
        return y.astype(jnp.float32)


def _reference(x, weight, bias, channel, patch_size, ori,
               cast_dtype=None, store_dtype=None):
    """Pure-JAX reference reproducing the PyTorch forward.

    cast_dtype/store_dtype mimic the kernel's bf16 input cast / bf16
    intermediate store (f32 accumulate in both cases)."""
    b_o, c_o, h, w = ori
    p = patch_size
    h_, w_ = h // p, w // p
    xx = x if cast_dtype is None else x.astype(cast_dtype)
    ww = weight if cast_dtype is None else weight.astype(cast_dtype)
    y = jnp.einsum('bne,oe->bno', xx, ww,
                   preferred_element_type=jnp.float32) + bias
    if store_dtype is not None:
        y = y.astype(store_dtype)
    b = x.shape[0]
    y = y.reshape(b, h_, w_, p, p, channel)
    y = jnp.transpose(y, (0, 5, 1, 3, 2, 4))
    return y.reshape(b, channel, h_ * p, w_ * p).astype(jnp.float32)


if __name__ == "__main__":
    # Small demo shapes: channel=4, embed_dim=32, patch_size=4.
    # ori image is NCHW (2, 4, 16, 16) -> h_=w_=4 -> num_tokens=16.
    channel, embed_dim, patch_size = 4, 32, 4
    b, h, w = 2, 16, 16
    ori = (b, channel, h, w)
    n_tok = (h // patch_size) * (w // patch_size)

    key = jax.random.PRNGKey(0)
    kx, kp = jax.random.split(key)
    x = jax.random.normal(kx, (b, n_tok, embed_dim), jnp.float32)

    # Default (production) tile settings; tiles are clamped to the small demo
    # dims and split so the grid still has >= 2 blocks (megacore check).
    mod = DePatchPallas(channel=channel, embed_dim=embed_dim,
                        patch_size=patch_size, key=kp)
    out = jax.block_until_ready(mod(x, ori))
    assert out.shape == (b, channel, h, w), out.shape

    # Tight check vs a reference mimicking the kernel numerics exactly
    # (bf16 inputs, f32 accumulate, bf16 intermediate store).
    ref_bf16 = _reference(x, mod.weight, mod.bias, channel, patch_size, ori,
                          cast_dtype=jnp.bfloat16, store_dtype=jnp.bfloat16)
    assert jnp.allclose(out, ref_bf16, atol=2e-2, rtol=2e-2), \
        float(jnp.max(jnp.abs(out - ref_bf16)))

    # Loose check vs the pure-f32 PyTorch-equivalent forward (bf16 error only).
    ref_f32 = _reference(x, mod.weight, mod.bias, channel, patch_size, ori)
    assert jnp.allclose(out, ref_f32, atol=1e-1, rtol=1e-1), \
        float(jnp.max(jnp.abs(out - ref_f32)))

    # Ragged-final-block / masked-store path: tm=24 does not divide M=32
    # (blocks of 24 + 8); must match the default-tiled output (K un-tiled,
    # so per-element math is identical).
    mod_ragged = DePatchPallas(channel=channel, embed_dim=embed_dim,
                               patch_size=patch_size, key=kp, tm=24)
    out_ragged = jax.block_until_ready(mod_ragged(x, ori))
    assert jnp.allclose(out, out_ragged, atol=1e-5, rtol=1e-5), \
        float(jnp.max(jnp.abs(out - out_ragged)))

    # f32 fallback path (precision-parity knob kept configurable).
    mod_f32 = DePatchPallas(channel=channel, embed_dim=embed_dim,
                            patch_size=patch_size, key=kp,
                            compute_dtype=jnp.float32)
    out_f32 = jax.block_until_ready(mod_f32(x, ori))
    assert jnp.allclose(out_f32, ref_f32, atol=1e-2, rtol=1e-2), \
        float(jnp.max(jnp.abs(out_f32 - ref_f32)))

    print("KERNEL_OK")
</pallas_src>

<mosaic_0001>
module attributes {stable_mosaic.version = 11 : i64} {
  func.func @_linear_bias_kernel(%arg0: i32, %arg1: i32, %arg2: memref<16x32xf32, #tpu.memory_space<vmem>>, %arg3: memref<32x64xbf16, #tpu.memory_space<vmem>>, %arg4: memref<1x64xf32, #tpu.memory_space<vmem>>, %arg5: memref<16x64xbf16, #tpu.memory_space<vmem>>) attributes {dimension_semantics = [#tpu.dimension_semantics<parallel>, #tpu.dimension_semantics<parallel>], iteration_bounds = array<i64: 1, 2>, scalar_prefetch = 0 : i64, scratch_operands = 0 : i64, tpu.core_type = #tpu.core_type<tc>, window_params = [{transform_indices = @transform_0, window_bounds = array<i64: 16, 32>}, {transform_indices = @transform_1, window_bounds = array<i64: 32, 64>}, {transform_indices = @transform_2, window_bounds = array<i64: 1, 64>}, {transform_indices = @transform_3, window_bounds = array<i64: 16, 64>}]} {
    %c0 = arith.constant 0 : index
    %c0_0 = arith.constant 0 : index
    %0 = vector.load %arg2[%c0, %c0_0] : memref<16x32xf32, #tpu.memory_space<vmem>>, vector<16x32xf32>
    %1 = arith.truncf %0 : vector<16x32xf32> to vector<16x32xbf16>
    %c0_1 = arith.constant 0 : index
    %c0_2 = arith.constant 0 : index
    %2 = vector.load %arg3[%c0_1, %c0_2] : memref<32x64xbf16, #tpu.memory_space<vmem>>, vector<32x64xbf16>
    %cst = arith.constant dense<0.000000e+00> : vector<16x64xf32>
    %3 = tpu.matmul %1, %2, %cst {dimension_numbers = #tpu.dot_dimension_numbers<[1], [0], [0], [1], [0, 0, 1, 1], [], []>} : vector<16x32xbf16>, vector<32x64xbf16>, vector<16x64xf32> -> vector<16x64xf32>
    %c0_3 = arith.constant 0 : index
    %c0_4 = arith.constant 0 : index
    %4 = vector.load %arg4[%c0_3, %c0_4] : memref<1x64xf32, #tpu.memory_space<vmem>>, vector<1x64xf32>
    %5 = vector.broadcast %4 : vector<1x64xf32> to vector<16x64xf32>
    %6 = arith.addf %3, %5 : vector<16x64xf32>
    %7 = arith.truncf %6 : vector<16x64xf32> to vector<16x64xbf16>
    %c0_5 = arith.constant 0 : index
    %c0_6 = arith.constant 0 : index
    %8 = vector.load %arg5[%c0_5, %c0_6] : memref<16x64xbf16, #tpu.memory_space<vmem>>, vector<16x64xbf16>
    tpu.vector_store %arg5[%c0_5, %c0_6], %7 {strides = array<i32>} : memref<16x64xbf16, #tpu.memory_space<vmem>>, vector<16x64xbf16>,
    return
  }
  func.func @transform_0(%arg0: i32, %arg1: i32) -> (i32, i32) {
    %c0_i32 = arith.constant 0 : i32
    %c0_i32_0 = arith.constant 0 : i32
    return %arg1, %c0_i32 : i32, i32
  }
  func.func @transform_1(%arg0: i32, %arg1: i32) -> (i32, i32) {
    %c0_i32 = arith.constant 0 : i32
    %c0_i32_0 = arith.constant 0 : i32
    return %c0_i32, %arg0 : i32, i32
  }
  func.func @transform_2(%arg0: i32, %arg1: i32) -> (i32, i32) {
    %c0_i32 = arith.constant 0 : i32
    %c0_i32_0 = arith.constant 0 : i32
    return %c0_i32, %arg0 : i32, i32
  }
  func.func @transform_3(%arg0: i32, %arg1: i32) -> (i32, i32) {
    %c0_i32 = arith.constant 0 : i32
    return %arg1, %arg0 : i32, i32
  }
}

</mosaic_0001>

<bundles_post_ra>
// kernel: tpu_custom_call.1
= control target key start
LH: loop header
LB: loop body
LE: loop exit
PB: predicated region body
PF: predicated region fallthrough
CT: control target
= control target key end

     0   :  { %8 = vsyncpa [#allocation3], 0  ;;  %s968_s0 = inlined_call_operand.hbm [shape: f32[32,32], index: 0, kind: input, shape index: {}]   ;;  %s969_s1 = inlined_call_operand.hbm [shape: bf16[32,64], index: 1, kind: input, shape index: {}]   ;;  %s970_s2 = inlined_call_operand.vmem [shape: f32[1,64], index: 2, kind: input, shape index: {}]   ;;  %s971_s3 = inlined_call_operand.hbm [shape: bf16[32,64], index: 3, kind: output, shape index: {}]  }
   0x1   :  { %10 = vsyncpa [#allocation3 + $0x1], 0 }
   0x2   :  { %11 = vsyncpa [#allocation6], 0 }
   0x3   :  { %12 = vsyncpa [#allocation4], 0 }
   0x4   :  { %14 = vsyncpa [#allocation4 + $0x1], 0  ;;  %s745_s12 = smov 0   ;;  %s747_s13 = smov 0  }
   0x5   :  { %s749_s14 = smov 0   ;;  %s751_s15 = smov 0  }
   0x6   :  { %s753_s16 = smov 0   ;;  %s755_s17 = smov 0  }
   0x7 LB: > { %s446_s18 = sadd.s32 4294967295, %s712_s17   ;;  %s447_s19 = sadd.s32 4294967294, %s712_s17   ;;  %s712_s17 = sphi %s755_s17, %s20_s17   ;;  %s708_s16 = sphi %s753_s16, %s995_s16   ;;  %s704_s15 = sphi %s751_s15, %s994_s15   ;;  %s700_s14 = sphi %s749_s14, %s993_s14   ;;  %s696_s13 = sphi %s747_s13, %s992_s13   ;;  %s692_s12 = sphi %s745_s12, %s991_s12  }
   0x8   : > { %p52_p0 = scmp.ne.s32.totalorder %s696_s13, %s692_s12  ;;  %p779_p1 = scmp.eq.s32.totalorder %s446_s18, 0 }
   0x9   : > { %p783_p2 = scmp.eq.s32.totalorder %s446_s18, 1  ;;  %p136_p3 = scmp.eq.s32.totalorder %s447_s19, 1 }
   0xa   : > { %s976_s20 = scalar_select %p779_p1, 1, 0 }
   0xb   : > { %s977_s21 = scalar_select %p783_p2, 1, 0 }
   0xc   : > { %p789_p4 = por %p779_p1, %p52_p0  ;;  %p448_p5 = scmp.ge.s32.totalorder %s712_s17, 1 }
   0xd   : > { %p794_p6 = por %p136_p3, %p52_p0  ;;  %p143_p7 = scmp.lt.s32.totalorder %s712_s17, 3 }
   0xe   : > { %s978_s22 = scalar_select %p789_p4, 1, 0 }
   0xf   : > { %s979_s23 = scalar_select %p794_p6, 1, 0 }
  0x10   : > { %p799_p8 = pnand %p448_p5, %p143_p7  ;;  %s714_s25 = smov [#allocation5]  }
  0x11   : > { %s157_s26 = sshll.u32 %s714_s25, 4  ;;  %s29_s28 = sadd.s32 1, %s708_s16  ;;  %s158_s26 = int_to_ptr.vmem [resolvable:$true] %s157_s26 }
  0x12   : > { %s980_s24 = scalar_select %p799_p8, 1, 0 }
  0x13   : > { %p493_p9 = pneg %p799_p8  ;;  %s568_s4 = scalar_lea.hbm %s969_s1, 256 }
  0x14   : > { %p569_p12 = scmp.ne.s32.totalorder %s969_s1, %s568_s4  ;;  %p575_p5 = scmp.lt.u32.totalorder %s568_s4, %s969_s1 }
  0x15   : > { %p808_p11 = pnand %p493_p9, %p779_p1 }
  0x17   : > { %p570_p13 = pneg %p808_p11 }
  0x19   : > { %p571_p0 = pnand %p570_p13, %p569_p12 }
  0x1b   : > { %p572_p3 = pneg %p571_p0 }
  0x1d   : > { %p577_p7 = pnand %p575_p5, %p572_p3 }
  0x1f   : > { %580 = shalt.err (!%p577_p7)
}
  0x20   : > { %s581_s9 = scalar_lea.vmem %s158_s26, 256  ;;  %p589_p1 = scmp.lt.s32.totalorder %s158_s26, %s158_s26 }
  0x21   : > { %p582_p9 = scmp.ne.s32.totalorder %s158_s26, %s581_s9  ;;  %p590_p4 = scmp.lt.s32.totalorder %s581_s9, %s581_s9 }
  0x23   : > { %p584_p10 = pnand %p582_p9, %p570_p13  ;;  %p591_p8 = por %p590_p4, %p589_p1 }
  0x25   : > { %p585_p6 = pneg %p584_p10 }
  0x27   : > { %p592_p2 = pnand %p591_p8, %p585_p6 }
  0x29   : > { %595 = shalt.err (!%p592_p2)
}
  0x2a   : > { %s715_s10 = smov 64   ;;  %s716_s11 = smov 4  }
  0x2b   : > { %496 = dma.hbm_to_vmem [thread:$0]  (!%p808_p11), %s969_s1, 256, %s158_s26, [#allocation6], %s715_s10, %s715_s10, %s716_s11  }
  0x2c   : > { %p30_p1 = scmp.ge.s32.totalorder %s29_s28, 2  ;;  %s39_s25 = sadd.s32 1, %s700_s14 }
  0x2d   : > { %p46_p2 = scmp.ne.s32.totalorder %s700_s14, %s696_s13  ;;  %p47_p4 = scmp.eq.s32.totalorder %s712_s17, 0 }
  0x2e   : > { %s997_s28 = smov (%p30_p1, %s29_s28), 0  ;;  %p983_p8 = scmp.ne.s32.totalorder %s977_s21, 0 }
  0x2f   : > { %p835_p6 = por %p47_p4, %p46_p2  ;;  %s36_s27 = ssub.s32 %s708_s16, %s997_s28 }
  0x30   : > { %p841_p10 = por %p983_p8, %p46_p2  ;;  %p506_p12 = scmp.lt.s32.totalorder %s712_s17, 2 }
  0x31   : > { %p37_p11 = scmp.eq.s32.totalorder %s36_s27, 0  ;;  %s177_s26 = sand.u32 1, %s700_s14  }
  0x32   : > { %s452_s4 = sshll.u32 %s177_s26, 4  ;;  %s470_s6 = sshll.u32 %s708_s16, 8 }
  0x33   : > { %s850_s5 = scalar_select %p37_p11, %s700_s14, %s39_s25  }
  0x34   : > { %s856_s9 = scalar_lea.hbm %s968_s0, %s470_s6  ;;  %s181_s21 = scalar_lea.vmem [#allocation2], %s452_s4 }
  0x35   : > { %s188_s10 = sshll.u32 %s181_s21, 4  ;;  %p862_p13 = pnand %p506_p12, %p835_p6  ;;  %s858_s10 = int_to_ptr.vmem [resolvable:$true] %s188_s10 }
  0x36   : > { %s866_s18 = scalar_lea.sflag [#allocation3], %s177_s26  ;;  %s596_s19 = scalar_lea.hbm %s856_s9, 256 }
  0x37   : > { %p597_p0 = scmp.ne.s32.totalorder %s856_s9, %s596_s19  ;;  %p598_p3 = pneg %p862_p13 }
  0x38   : > { %s601_s29 = scalar_lea.hbm %s968_s0, 512  ;;  %p602_p9 = scmp.lt.u32.totalorder %s856_s9, %s968_s0 }
  0x39   : > { %p599_p5 = pnand %p598_p3, %p597_p0  ;;  %p603_p1 = scmp.lt.u32.totalorder %s601_s29, %s596_s19 }
  0x3a   : > { %p605_p4 = scmp.lt.u32.totalorder %s596_s19, %s856_s9 }
  0x3b   : > { %p600_p7 = pneg %p599_p5  ;;  %p604_p2 = por %p603_p1, %p602_p9 }
  0x3d   : > { %p606_p6 = por %p605_p4, %p604_p2 }
  0x3f   : > { %p607_p8 = pnand %p606_p6, %p600_p7 }
  0x41   : > { %610 = shalt.err (!%p607_p8)
}
  0x42   : > { %s611_s26 = scalar_lea.vmem %s858_s10, 256  ;;  %s717_s7 = smov [#allocation2]  }
  0x43   : > { %p612_p12 = scmp.ne.s32.totalorder %s858_s10, %s611_s26  ;;  %s616_s8 = sshll.u32 %s717_s7, 4  ;;  %s617_s8 = int_to_ptr.vmem [resolvable:$false] %s616_s8 }
  0x44   : > { %s618_s21 = scalar_lea.vmem %s617_s8, 512  ;;  %p619_p5 = scmp.lt.s32.totalorder %s858_s10, %s617_s8 }
  0x45   : > { %p614_p11 = pnand %p612_p12, %p598_p3  ;;  %p620_p9 = scmp.lt.s32.totalorder %s618_s21, %s611_s26 }
  0x47   : > { %p615_p0 = pneg %p614_p11  ;;  %p621_p1 = por %p620_p9, %p619_p5 }
  0x49   : > { %p622_p2 = pnand %p621_p1, %p615_p0 }
  0x4b   : > { %625 = shalt.err (!%p622_p2)
}
  0x4c   : > { %s718_s19 = smov 128   ;;  %s719_s25 = smov 8  }
  0x4d   : > { %500 = dma.hbm_to_vmem [thread:$0]  (!%p862_p13), %s856_s9, 256, %s858_s10, %s866_s18, %s718_s19, %s718_s19, %s719_s25  }
  0x4e   : > { %p986_p3 = scmp.ne.s32.totalorder %s980_s24, 0 }
  0x4f   : > { %s897_s27 = sand.u32 (!%p986_p3), 1, %s696_s13   ;;  %p987_p7 = scmp.ne.s32.totalorder (!%p986_p3), %s978_s22, 0 }
  0x50   : > { %200 = sbr.rel (%p986_p3) target bundleno = 333 (0x14d), region = 32  ;;  %s456_s29 = sshll.u32 (!%p986_p3), %s897_s27, 4 }
  0x51   : > { %s203_s4 = scalar_lea.sflag (!%p986_p3), [#allocation3], %s897_s27  ;;  %s206_s6 = scalar_lea.vmem (!%p986_p3), [#allocation2], %s456_s29 }
  0x57   : > { %679 = dma.done.wait (%p987_p7), %s203_s4, 256  }
  0x58   : > { %681 = vsyncadd (%p987_p7), %s203_s4, 4294967040  ;;  %p988_p4 = scmp.ne.s32.totalorder %s976_s20, 0 }
  0x5a   : > { %683 = dma.done.wait (%p988_p4), [#allocation6], 256  }
  0x5b   : > { %685 = vsyncadd (%p988_p4), [#allocation6], 4294967040  ;;  %v720_v0 = vmov 0.0   ;;  %vm721_vm0 = vmmov 0   ;;  %v566_v1 = vld [vmem:[#allocation5] sm:$0xff]   ;;  %v567_v2 = vld [vmem:[#allocation5 + $0x8] sm:$0xff]  }
  0x5c   : > { %477 = vmatprep.subr.bf16.mxu0 %v720_v0  ;;  %481 = vmatprep.mubr.msk.bf16.mxu0 %vm721_vm0, %v720_v0  ;;  %v242_v3 = vld [vmem:[%s206_s6] sm:$0xff]  ;;  %v243_v4 = vld [vmem:[%s206_s6 + $0x8] sm:$0xff]  ;;  %vm268_vm1 = vcmask 261120   ;;  %s458_s22 = sshll.u32 %s897_s27, 3  ;;  %s473_s11 = sshll.u32 %s704_s15, 7  ;;  %vm321_vm2 = vcmask 519168  }
  0x5d   : > { %478 = vmatpush3.bf16.msra.mxu0 %v566_v1  ;;  %v244_v5 = vpack.c.bf16 %v243_v4, %v242_v3  ;;  %v459_v6 = vld [vmem:[%s970_s2] ss:$0 sm:$0xff]  ;;  %s235_s9 = scalar_lea.vmem [#allocation7], %s458_s22  ;;  %s917_s7 = scalar_lea.hbm %s971_s3, %s473_s11 }
  0x5e   : > { %479 = vmatprep.subr.bf16.mxu0 %v720_v0  ;;  %s339_s10 = sshll.u32 %s235_s9, 4  ;;  %s325_s8 = scalar_lea.sflag [#allocation4], %s897_s27  ;;  %s919_s10 = int_to_ptr.vmem [resolvable:$true] %s339_s10 }
  0x5f   : > { %s626_s15 = scalar_lea.vmem %s919_s10, 128  ;;  %s722_s21 = smov [#allocation7]  }
  0x60   : > { %p627_p13 = scmp.ne.s32.totalorder %s919_s10, %s626_s15  ;;  %s630_s19 = sshll.u32 %s722_s21, 4  ;;  %s631_s19 = int_to_ptr.vmem [resolvable:$false] %s630_s19 }
  0x61   : > { %480 = vmatpush3.bf16.msra.mxu0 %v567_v2  ;;  %s632_s25 = scalar_lea.vmem %s631_s19, 256  ;;  %p633_p12 = scmp.lt.s32.totalorder %s919_s10, %s631_s19 }
  0x62   : > { %p628_p6 = pnand %p627_p13, %p841_p10  ;;  %p634_p11 = scmp.lt.s32.totalorder %s632_s25, %s626_s15 }
  0x64   : > { %482 = vmatmul.mubr.msk.bf16.vlgmr.msra.gmra.mrb[0].mxu0 %vm268_vm1, %v244_v5  ;;  %p629_p8 = pneg %p628_p6  ;;  %p635_p0 = por %p634_p11, %p633_p12 }
  0x66   : > { %p636_p5 = pnand %p635_p0, %p629_p8 }
 0x137   : > { %v306_v7 = vpop.f32.mrb[0].mxu0 }
 0x138   : > { %v307_v8 = vadd.f32 %v459_v6, %v306_v7  ;;  %v483_v9 = vpop.f32.mrb[1].mxu0 }
 0x139   : > { %v309_v10 = vpop.f32.mrb[2].mxu0 }
 0x13a   : > { %v471_v11 = vpack.c.bf16 %v307_v8, %v307_v8  ;;  %v310_v12 = vadd.f32 %v459_v6, %v309_v10  ;;  %v484_v13 = vpop.f32.mrb[3].mxu0 }
 0x13c   : > { %322 = vst.msk [vmem:[%s235_s9] sm:$0xf] %vm321_vm2, %v471_v11  ;;  %v472_v14 = vpack.c.bf16 %v310_v12, %v310_v12 }
 0x13e   : > { %323 = vst.msk [vmem:[%s235_s9 + $0x4] sm:$0xf] %vm321_vm2, %v472_v14 }
 0x13f   : > { %639 = shalt.err (!%p636_p5)
}
 0x140   : > { %s640_s29 = scalar_lea.hbm %s917_s7, 128  ;;  %s644_s22 = scalar_lea.hbm %s971_s3, 256 }
 0x141   : > { %p641_p9 = scmp.ne.s32.totalorder %s917_s7, %s640_s29  ;;  %p645_p3 = scmp.lt.u32.totalorder %s917_s7, %s971_s3 }
 0x142   : > { %p646_p7 = scmp.lt.u32.totalorder %s644_s22, %s640_s29  ;;  %p648_p13 = scmp.lt.u32.totalorder %s640_s29, %s917_s7 }
 0x143   : > { %p642_p1 = pnand %p641_p9, %p841_p10 }
 0x144   : > { %p647_p4 = por %p646_p7, %p645_p3 }
 0x145   : > { %p643_p2 = pneg %p642_p1 }
 0x146   : > { %p649_p6 = por %p648_p13, %p647_p4 }
 0x148   : > { %p650_p8 = pnand %p649_p6, %p643_p2 }
 0x14a   : > { %653 = shalt.err (!%p650_p8)
}
 0x14b   : > { %s723_s9 = smov 64   ;;  %s724_s11 = smov 4  }
 0x14c   : > { %491 = dma.vmem_to_hbm [thread:$0]  (%p841_p10), %s919_s10, 128, %s917_s7, %s325_s8, %s723_s9, %s723_s9, %s724_s11  }
 0x14d PF: > { %s354_s18 = sand.u32 1, %s692_s12   ;;  %p989_p12 = scmp.ne.s32.totalorder %s979_s23, 0 }
 0x14e   : > { %p990_p11 = scmp.ge.s32.totalorder %s712_s17, 2  ;;  %s355_s26 = scalar_lea.sflag [#allocation4], %s354_s18 }
 0x150   : > { %p502_p0 = pnand %p990_p11, %p989_p12 }
 0x152   : > { %687 = dma.done.wait (!%p502_p0), %s355_s26, 128  }
 0x153   : > { %689 = vsyncadd (!%p502_p0), %s355_s26, 4294967168  ;;  %s20_s17 = sadd.s32 1, %s712_s17   ;;  %s991_s12 = smov %s696_s13 }
 0x154   : > { %p17_p5 = scmp.ge.s32.totalorder %s20_s17, 4   ;;  %s992_s13 = smov %s700_s14 }
 0x155   : > { %s993_s14 = smov %s850_s5  ;;  %s994_s15 = smov %s708_s16 }
 0x156   : > { %s995_s16 = smov %s997_s28  ;;  %19 = sbr.rel (!%p17_p5) target bundleno = 7 (0x7), region = 85 }
 0x15d   :  { %360 = vsyncpa [#allocation3], 1 }
 0x15e   :  { %362 = vsyncpa [#allocation3 + $0x1], 1 }
 0x15f   :  { %363 = vsyncpa [#allocation6], 1 }
 0x160   :  { %364 = vsyncpa [#allocation4], 1 }
 0x161   :  { %366 = vsyncpa [#allocation4 + $0x1], 1 }

</bundles_post_ra>
